<compile_context>
chip_gen: v7x
topology: tpu7x:2x2x1
jax: 0.10.0
libtpu: 0.0.40
codegen_flags: <defaults>
</compile_context>

<pallas_src>
import functools

import jax
import jax.numpy as jnp
from jax import lax
from jax.experimental import pallas as pl
from jax.experimental.pallas import tpu as pltpu

BN_EPS = 1e-5


def _round_up(n, m):
    return ((n + m - 1) // m) * m


def _mlp_kernel(x_ref, w1_ref, w2_ref, w3_ref, vec_ref, o_ref, *,
                b_real, h_pad, c_pad, matmul_dtype):
    """Whole forward pass, all operands VMEM-resident (small problem)."""
    x = x_ref[...]                      # (B_pad, D_pad) f32
    vecs = vec_ref[...]                 # (8, W) f32, packed per-feature params

    b1, g1, be1 = vecs[0:1, :h_pad], vecs[1:2, :h_pad], vecs[2:3, :h_pad]
    b2, g2, be2 = vecs[3:4, :h_pad], vecs[4:5, :h_pad], vecs[5:6, :h_pad]
    b3 = vecs[6:7, :c_pad]

    b_pad = x.shape[0]
    inv_b = 1.0 / float(b_real)
    if b_pad != b_real:
        row_ids = lax.broadcasted_iota(jnp.int32, (b_pad, 1), 0)
        mask = (row_ids < b_real).astype(jnp.float32)   # (B_pad, 1)
    else:
        mask = None

    def linear(h, w_ref, b):
        lhs = h.astype(matmul_dtype)
        rhs = w_ref[...].astype(matmul_dtype)
        return jnp.dot(lhs, rhs, preferred_element_type=jnp.float32) + b

    def bn_relu(h, g, be):
        # Training-mode BatchNorm1d: batch mean, biased batch variance.
        if mask is None:
            mean = jnp.mean(h, axis=0, keepdims=True)
            d = h - mean
            var = jnp.mean(d * d, axis=0, keepdims=True)
        else:
            mean = jnp.sum(h * mask, axis=0, keepdims=True) * inv_b
            d = (h - mean) * mask
            var = jnp.sum(d * d, axis=0, keepdims=True) * inv_b
        # Folded affine: one multiply-add per element; rsqrt on the EUP.
        scale = g * lax.rsqrt(var + BN_EPS)
        shift = be - mean * scale
        return jnp.maximum(h * scale + shift, 0.0)

    h = bn_relu(linear(x, w1_ref, b1), g1, be1)
    h = bn_relu(linear(h, w2_ref, b2), g2, be2)
    o_ref[...] = linear(h, w3_ref, b3).astype(o_ref.dtype)


def mlp_classifier_forward(x, params, *, use_bf16_matmul=False):
    """x: (B, input_dim) float32. params: dict from init_params."""
    B, D = x.shape
    H = params["w1"].shape[1]
    C = params["w3"].shape[1]

    B_pad = _round_up(B, 8)
    D_pad = _round_up(D, 128)
    H_pad = _round_up(H, 128)
    C_pad = _round_up(C, 128)
    W = max(H_pad, C_pad)

    # Zero-pad to lane/sublane-friendly shapes (zeros never change the math:
    # padded K rows contribute 0 to matmuls, padded gamma entries are 0 so
    # padded hidden columns stay 0 through BN+ReLU, padded batch rows are
    # masked out of BN stats and sliced off at the end).
    x_p = jnp.pad(x, ((0, B_pad - B), (0, D_pad - D)))
    w1 = jnp.pad(params["w1"], ((0, D_pad - D), (0, H_pad - H)))
    w2 = jnp.pad(params["w2"], ((0, H_pad - H), (0, H_pad - H)))
    w3 = jnp.pad(params["w3"], ((0, H_pad - H), (0, C_pad - C)))

    def row(v):
        v = v.reshape(1, -1).astype(jnp.float32)
        return jnp.pad(v, ((0, 0), (0, W - v.shape[1])))

    # Pack all per-feature vectors into one (8, W) tile: a single DMA.
    vec = jnp.concatenate(
        [row(params["b1"]), row(params["g1"]), row(params["be1"]),
         row(params["b2"]), row(params["g2"]), row(params["be2"]),
         row(params["b3"]), jnp.zeros((1, W), jnp.float32)],
        axis=0)

    inputs = (x_p, w1, w2, w3, vec)

    def full_spec(arr):
        nd = arr.ndim
        return pl.BlockSpec(arr.shape, lambda i, _nd=nd: (0,) * _nd)

    # Right-size the VMEM request from the real footprint (keep headroom for
    # v7x's 64 MiB physical VMEM instead of blindly asking for all of it).
    total_bytes = sum(int(a.size) * a.dtype.itemsize for a in inputs)
    total_bytes += B_pad * C_pad * 4
    vmem_limit = int(min(max(2 * total_bytes + (2 << 20), 8 << 20), 64 << 20))

    kernel = functools.partial(
        _mlp_kernel,
        b_real=B, h_pad=H_pad, c_pad=C_pad,
        matmul_dtype=jnp.bfloat16 if use_bf16_matmul else jnp.float32)

    out = pl.pallas_call(
        kernel,
        out_shape=jax.ShapeDtypeStruct((B_pad, C_pad), jnp.float32),
        grid=(1,),
        in_specs=[full_spec(a) for a in inputs],
        out_specs=pl.BlockSpec((B_pad, C_pad), lambda i: (0, 0)),
        compiler_params=pltpu.CompilerParams(
            dimension_semantics=("arbitrary",),
            vmem_limit_bytes=vmem_limit),
    )(*inputs)

    return out[:B, :C]


def init_params(key, input_dim, num_classes, hidden_dim):
    """Deterministic init mimicking torch defaults (U(-1/sqrt(fan_in), ..))."""
    ks = jax.random.split(key, 6)

    def linear_init(kw, kb, fan_in, fan_out):
        bound = 1.0 / jnp.sqrt(fan_in)
        w = jax.random.uniform(kw, (fan_in, fan_out), jnp.float32, -bound, bound)
        b = jax.random.uniform(kb, (1, fan_out), jnp.float32, -bound, bound)
        return w, b

    w1, b1 = linear_init(ks[0], ks[1], input_dim, hidden_dim)
    w2, b2 = linear_init(ks[2], ks[3], hidden_dim, hidden_dim)
    w3, b3 = linear_init(ks[4], ks[5], hidden_dim, num_classes)

    return dict(
        w1=w1, b1=b1,
        g1=jnp.ones((1, hidden_dim), jnp.float32),
        be1=jnp.zeros((1, hidden_dim), jnp.float32),
        w2=w2, b2=b2,
        g2=jnp.ones((1, hidden_dim), jnp.float32),
        be2=jnp.zeros((1, hidden_dim), jnp.float32),
        w3=w3, b3=b3,
    )


def mlp_classifier_ref(x, p):
    """Pure-JAX reference matching the PyTorch forward (training-mode BN)."""
    def bn_relu(h, g, be):
        mean = jnp.mean(h, axis=0, keepdims=True)
        var = jnp.mean((h - mean) ** 2, axis=0, keepdims=True)
        return jnp.maximum((h - mean) / jnp.sqrt(var + BN_EPS) * g + be, 0.0)

    h = bn_relu(x @ p["w1"] + p["b1"], p["g1"], p["be1"])
    h = bn_relu(h @ p["w2"] + p["b2"], p["g2"], p["be2"])
    return h @ p["w3"] + p["b3"]


if __name__ == "__main__":
    key = jax.random.PRNGKey(0)
    kx, kp, kx2, kp2 = jax.random.split(key, 4)

    # Case 1: small, aligned-ish shapes.
    B, INPUT_DIM, NUM_CLASSES, HIDDEN = 16, 32, 10, 64
    x = jax.random.normal(kx, (B, INPUT_DIM), jnp.float32)
    params = init_params(kp, INPUT_DIM, NUM_CLASSES, HIDDEN)

    out = jax.block_until_ready(mlp_classifier_forward(x, params))
    ref = mlp_classifier_ref(x, params)
    assert out.shape == (B, NUM_CLASSES)
    assert jnp.allclose(out, ref, atol=1e-4, rtol=1e-4), "mismatch vs reference (case 1)"

    # Case 2: ragged shapes exercise the padding + masked-BN-stats path.
    B2, D2, C2, H2 = 9, 30, 7, 48
    x2 = jax.random.normal(kx2, (B2, D2), jnp.float32)
    params2 = init_params(kp2, D2, C2, H2)

    out2 = jax.block_until_ready(mlp_classifier_forward(x2, params2))
    ref2 = mlp_classifier_ref(x2, params2)
    assert out2.shape == (B2, C2)
    assert jnp.allclose(out2, ref2, atol=1e-4, rtol=1e-4), "mismatch vs reference (case 2)"

    print("KERNEL_OK")
</pallas_src>

<mosaic_0001>
module attributes {stable_mosaic.version = 11 : i64} {
  func.func @_mlp_kernel(%arg0: i32, %arg1: memref<16x128xf32, #tpu.memory_space<vmem>>, %arg2: memref<128x128xf32, #tpu.memory_space<vmem>>, %arg3: memref<128x128xf32, #tpu.memory_space<vmem>>, %arg4: memref<128x128xf32, #tpu.memory_space<vmem>>, %arg5: memref<8x128xf32, #tpu.memory_space<vmem>>, %arg6: memref<16x128xf32, #tpu.memory_space<vmem>>) attributes {dimension_semantics = [#tpu.dimension_semantics<arbitrary>], iteration_bounds = array<i64: 1>, scalar_prefetch = 0 : i64, scratch_operands = 0 : i64, tpu.core_type = #tpu.core_type<tc>, window_params = [{pipeline_mode = #tpu.pipeline_mode<synchronous>, transform_indices = @transform_0, window_bounds = array<i64: 16, 128>}, {pipeline_mode = #tpu.pipeline_mode<synchronous>, transform_indices = @transform_1, window_bounds = array<i64: 128, 128>}, {pipeline_mode = #tpu.pipeline_mode<synchronous>, transform_indices = @transform_2, window_bounds = array<i64: 128, 128>}, {pipeline_mode = #tpu.pipeline_mode<synchronous>, transform_indices = @transform_3, window_bounds = array<i64: 128, 128>}, {pipeline_mode = #tpu.pipeline_mode<synchronous>, transform_indices = @transform_4, window_bounds = array<i64: 8, 128>}, {pipeline_mode = #tpu.pipeline_mode<synchronous>, transform_indices = @transform_5, window_bounds = array<i64: 16, 128>}]} {
    %c0 = arith.constant 0 : index
    %c0_0 = arith.constant 0 : index
    %0 = vector.load %arg1[%c0, %c0_0] : memref<16x128xf32, #tpu.memory_space<vmem>>, vector<16x128xf32>
    %c0_1 = arith.constant 0 : index
    %c0_2 = arith.constant 0 : index
    %1 = vector.load %arg5[%c0_1, %c0_2] : memref<8x128xf32, #tpu.memory_space<vmem>>, vector<8x128xf32>
    %2 = vector.extract_strided_slice %1 {offsets = [0, 0], sizes = [1, 128], strides = [1, 1]} : vector<8x128xf32> to vector<1x128xf32>
    %3 = vector.extract_strided_slice %1 {offsets = [1, 0], sizes = [1, 128], strides = [1, 1]} : vector<8x128xf32> to vector<1x128xf32>
    %4 = vector.extract_strided_slice %1 {offsets = [2, 0], sizes = [1, 128], strides = [1, 1]} : vector<8x128xf32> to vector<1x128xf32>
    %5 = vector.extract_strided_slice %1 {offsets = [3, 0], sizes = [1, 128], strides = [1, 1]} : vector<8x128xf32> to vector<1x128xf32>
    %6 = vector.extract_strided_slice %1 {offsets = [4, 0], sizes = [1, 128], strides = [1, 1]} : vector<8x128xf32> to vector<1x128xf32>
    %7 = vector.extract_strided_slice %1 {offsets = [5, 0], sizes = [1, 128], strides = [1, 1]} : vector<8x128xf32> to vector<1x128xf32>
    %8 = vector.extract_strided_slice %1 {offsets = [6, 0], sizes = [1, 128], strides = [1, 1]} : vector<8x128xf32> to vector<1x128xf32>
    %c0_3 = arith.constant 0 : index
    %c0_4 = arith.constant 0 : index
    %9 = vector.load %arg2[%c0_3, %c0_4] : memref<128x128xf32, #tpu.memory_space<vmem>>, vector<128x128xf32>
    %cst = arith.constant dense<0.000000e+00> : vector<16x128xf32>
    %10 = tpu.matmul %0, %9, %cst {dimension_numbers = #tpu.dot_dimension_numbers<[1], [0], [0], [1], [0, 0, 1, 1], [], []>} : vector<16x128xf32>, vector<128x128xf32>, vector<16x128xf32> -> vector<16x128xf32>
    %11 = vector.broadcast %2 : vector<1x128xf32> to vector<16x128xf32>
    %12 = arith.addf %10, %11 : vector<16x128xf32>
    %cst_5 = arith.constant dense<0.000000e+00> : vector<128xf32>
    %13 = vector.multi_reduction <add>, %12, %cst_5 [0] : vector<16x128xf32> to vector<128xf32>
    %14 = vector.shape_cast %13 : vector<128xf32> to vector<1x128xf32>
    %cst_6 = arith.constant 1.600000e+01 : f32
    %15 = vector.broadcast %cst_6 : f32 to vector<1x128xf32>
    %16 = arith.divf %14, %15 : vector<1x128xf32>
    %17 = vector.broadcast %16 : vector<1x128xf32> to vector<16x128xf32>
    %18 = arith.subf %12, %17 : vector<16x128xf32>
    %19 = arith.mulf %18, %18 : vector<16x128xf32>
    %cst_7 = arith.constant dense<0.000000e+00> : vector<128xf32>
    %20 = vector.multi_reduction <add>, %19, %cst_7 [0] : vector<16x128xf32> to vector<128xf32>
    %21 = vector.shape_cast %20 : vector<128xf32> to vector<1x128xf32>
    %cst_8 = arith.constant 1.600000e+01 : f32
    %22 = vector.broadcast %cst_8 : f32 to vector<1x128xf32>
    %23 = arith.divf %21, %22 : vector<1x128xf32>
    %cst_9 = arith.constant 9.99999974E-6 : f32
    %24 = vector.broadcast %cst_9 : f32 to vector<1x128xf32>
    %25 = arith.addf %23, %24 : vector<1x128xf32>
    %26 = math.rsqrt %25 : vector<1x128xf32>
    %27 = arith.mulf %3, %26 : vector<1x128xf32>
    %28 = arith.mulf %16, %27 : vector<1x128xf32>
    %29 = arith.subf %4, %28 : vector<1x128xf32>
    %30 = vector.broadcast %27 : vector<1x128xf32> to vector<16x128xf32>
    %31 = arith.mulf %12, %30 : vector<16x128xf32>
    %32 = vector.broadcast %29 : vector<1x128xf32> to vector<16x128xf32>
    %33 = arith.addf %31, %32 : vector<16x128xf32>
    %cst_10 = arith.constant 0.000000e+00 : f32
    %34 = vector.broadcast %cst_10 : f32 to vector<16x128xf32>
    %35 = arith.maximumf %33, %34 : vector<16x128xf32>
    %c0_11 = arith.constant 0 : index
    %c0_12 = arith.constant 0 : index
    %36 = vector.load %arg3[%c0_11, %c0_12] : memref<128x128xf32, #tpu.memory_space<vmem>>, vector<128x128xf32>
    %cst_13 = arith.constant dense<0.000000e+00> : vector<16x128xf32>
    %37 = tpu.matmul %35, %36, %cst_13 {dimension_numbers = #tpu.dot_dimension_numbers<[1], [0], [0], [1], [0, 0, 1, 1], [], []>} : vector<16x128xf32>, vector<128x128xf32>, vector<16x128xf32> -> vector<16x128xf32>
    %38 = vector.broadcast %5 : vector<1x128xf32> to vector<16x128xf32>
    %39 = arith.addf %37, %38 : vector<16x128xf32>
    %cst_14 = arith.constant dense<0.000000e+00> : vector<128xf32>
    %40 = vector.multi_reduction <add>, %39, %cst_14 [0] : vector<16x128xf32> to vector<128xf32>
    %41 = vector.shape_cast %40 : vector<128xf32> to vector<1x128xf32>
    %cst_15 = arith.constant 1.600000e+01 : f32
    %42 = vector.broadcast %cst_15 : f32 to vector<1x128xf32>
    %43 = arith.divf %41, %42 : vector<1x128xf32>
    %44 = vector.broadcast %43 : vector<1x128xf32> to vector<16x128xf32>
    %45 = arith.subf %39, %44 : vector<16x128xf32>
    %46 = arith.mulf %45, %45 : vector<16x128xf32>
    %cst_16 = arith.constant dense<0.000000e+00> : vector<128xf32>
    %47 = vector.multi_reduction <add>, %46, %cst_16 [0] : vector<16x128xf32> to vector<128xf32>
    %48 = vector.shape_cast %47 : vector<128xf32> to vector<1x128xf32>
    %cst_17 = arith.constant 1.600000e+01 : f32
    %49 = vector.broadcast %cst_17 : f32 to vector<1x128xf32>
    %50 = arith.divf %48, %49 : vector<1x128xf32>
    %cst_18 = arith.constant 9.99999974E-6 : f32
    %51 = vector.broadcast %cst_18 : f32 to vector<1x128xf32>
    %52 = arith.addf %50, %51 : vector<1x128xf32>
    %53 = math.rsqrt %52 : vector<1x128xf32>
    %54 = arith.mulf %6, %53 : vector<1x128xf32>
    %55 = arith.mulf %43, %54 : vector<1x128xf32>
    %56 = arith.subf %7, %55 : vector<1x128xf32>
    %57 = vector.broadcast %54 : vector<1x128xf32> to vector<16x128xf32>
    %58 = arith.mulf %39, %57 : vector<16x128xf32>
    %59 = vector.broadcast %56 : vector<1x128xf32> to vector<16x128xf32>
    %60 = arith.addf %58, %59 : vector<16x128xf32>
    %cst_19 = arith.constant 0.000000e+00 : f32
    %61 = vector.broadcast %cst_19 : f32 to vector<16x128xf32>
    %62 = arith.maximumf %60, %61 : vector<16x128xf32>
    %c0_20 = arith.constant 0 : index
    %c0_21 = arith.constant 0 : index
    %63 = vector.load %arg4[%c0_20, %c0_21] : memref<128x128xf32, #tpu.memory_space<vmem>>, vector<128x128xf32>
    %cst_22 = arith.constant dense<0.000000e+00> : vector<16x128xf32>
    %64 = tpu.matmul %62, %63, %cst_22 {dimension_numbers = #tpu.dot_dimension_numbers<[1], [0], [0], [1], [0, 0, 1, 1], [], []>} : vector<16x128xf32>, vector<128x128xf32>, vector<16x128xf32> -> vector<16x128xf32>
    %65 = vector.broadcast %8 : vector<1x128xf32> to vector<16x128xf32>
    %66 = arith.addf %64, %65 : vector<16x128xf32>
    %c0_23 = arith.constant 0 : index
    %c0_24 = arith.constant 0 : index
    %67 = vector.load %arg6[%c0_23, %c0_24] : memref<16x128xf32, #tpu.memory_space<vmem>>, vector<16x128xf32>
    tpu.vector_store %arg6[%c0_23, %c0_24], %66 {strides = array<i32>} : memref<16x128xf32, #tpu.memory_space<vmem>>, vector<16x128xf32>,
    return
  }
  func.func @transform_0(%arg0: i32) -> (i32, i32) {
    %c0_i32 = arith.constant 0 : i32
    %c0_i32_0 = arith.constant 0 : i32
    %c0_i32_1 = arith.constant 0 : i32
    return %c0_i32, %c0_i32_0 : i32, i32
  }
  func.func @transform_1(%arg0: i32) -> (i32, i32) {
    %c0_i32 = arith.constant 0 : i32
    %c0_i32_0 = arith.constant 0 : i32
    %c0_i32_1 = arith.constant 0 : i32
    return %c0_i32, %c0_i32_0 : i32, i32
  }
  func.func @transform_2(%arg0: i32) -> (i32, i32) {
    %c0_i32 = arith.constant 0 : i32
    %c0_i32_0 = arith.constant 0 : i32
    %c0_i32_1 = arith.constant 0 : i32
    return %c0_i32, %c0_i32_0 : i32, i32
  }
  func.func @transform_3(%arg0: i32) -> (i32, i32) {
    %c0_i32 = arith.constant 0 : i32
    %c0_i32_0 = arith.constant 0 : i32
    %c0_i32_1 = arith.constant 0 : i32
    return %c0_i32, %c0_i32_0 : i32, i32
  }
  func.func @transform_4(%arg0: i32) -> (i32, i32) {
    %c0_i32 = arith.constant 0 : i32
    %c0_i32_0 = arith.constant 0 : i32
    %c0_i32_1 = arith.constant 0 : i32
    return %c0_i32, %c0_i32_0 : i32, i32
  }
  func.func @transform_5(%arg0: i32) -> (i32, i32) {
    %c0_i32 = arith.constant 0 : i32
    %c0_i32_0 = arith.constant 0 : i32
    %c0_i32_1 = arith.constant 0 : i32
    return %c0_i32, %c0_i32_0 : i32, i32
  }
}

</mosaic_0001>

<bundles_post_ra>
// kernel: tpu_custom_call.1
= control target key start
LH: loop header
LB: loop body
LE: loop exit
PB: predicated region body
PF: predicated region fallthrough
CT: control target
= control target key end

     0   :  { %10 = vsyncpa [#allocation3], 0  ;;  %s1001_s0 = inlined_call_operand.hbm [shape: f32[16,128], index: 0, kind: input, shape index: {}]   ;;  %s1002_s1 = inlined_call_operand.hbm [shape: f32[128,128], index: 1, kind: input, shape index: {}]   ;;  %s1003_s2 = inlined_call_operand.hbm [shape: f32[128,128], index: 2, kind: input, shape index: {}]   ;;  %s1004_s3 = inlined_call_operand.hbm [shape: f32[128,128], index: 3, kind: input, shape index: {}]   ;;  %s1005_s4 = inlined_call_operand.vmem [shape: f32[8,128], index: 4, kind: input, shape index: {}]   ;;  %s1006_s5 = inlined_call_operand.hbm [shape: f32[16,128], index: 5, kind: output, shape index: {}]  }
   0x1   :  { %11 = vsyncpa [#allocation6], 0 }
   0x2   :  { %12 = vsyncpa [#allocation9], 0 }
   0x3   :  { %13 = vsyncpa [#allocation4], 0  ;;  %s854_s18 = smov [#allocation5]   ;;  %s855_s20 = smov [#allocation2]  }
   0x4   :  { %s31_s19 = sshll.u32 %s854_s18, 4  ;;  %s19_s21 = sshll.u32 %s855_s20, 4  ;;  %s32_s19 = int_to_ptr.vmem [resolvable:$true] %s31_s19  ;;  %s891_s21 = int_to_ptr.vmem [resolvable:$true] %s19_s21 }
   0x5   :  { %s736_s24 = scalar_lea.hbm %s1002_s1, 2048 }
   0x6   :  { %p737_p0 = scmp.ne.s32.totalorder %s1002_s1, %s736_s24  ;;  %p740_p1 = scmp.lt.u32.totalorder %s736_s24, %s1002_s1 }
   0x8   :  { %p742_p2 = pnand %p740_p1, %p737_p0 }
   0xa   :  { %745 = shalt.err (!%p742_p2)
}
   0xb   :  { %s746_s29 = scalar_lea.vmem %s32_s19, 2048  ;;  %p751_p4 = scmp.lt.s32.totalorder %s32_s19, %s32_s19 }
   0xc   :  { %p747_p3 = scmp.ne.s32.totalorder %s32_s19, %s746_s29  ;;  %p752_p5 = scmp.lt.s32.totalorder %s746_s29, %s746_s29 }
   0xe   :  { %p753_p6 = por %p752_p5, %p751_p4 }
  0x10   :  { %p754_p7 = pnand %p753_p6, %p747_p3 }
  0x12   :  { %757 = shalt.err (!%p754_p7)
}
  0x13   :  { %s856_s30 = smov 128   ;;  %s857_s6 = smov 8  }
  0x14   :  { %37 = dma.hbm_to_vmem [thread:$0]  %s1002_s1, 2048, %s32_s19, [#allocation6], %s856_s30, %s856_s30, %s857_s6  }
  0x15   :  { %s758_s11 = scalar_lea.hbm %s1001_s0, 256 }
  0x16   :  { %p759_p8 = scmp.ne.s32.totalorder %s1001_s0, %s758_s11  ;;  %p762_p9 = scmp.lt.u32.totalorder %s758_s11, %s1001_s0 }
  0x18   :  { %p764_p10 = pnand %p762_p9, %p759_p8 }
  0x1a   :  { %767 = shalt.err (!%p764_p10)
}
  0x1b   :  { %s768_s16 = scalar_lea.vmem %s891_s21, 256  ;;  %p773_p12 = scmp.lt.s32.totalorder %s891_s21, %s891_s21 }
  0x1c   :  { %p769_p11 = scmp.ne.s32.totalorder %s891_s21, %s768_s16  ;;  %p774_p13 = scmp.lt.s32.totalorder %s768_s16, %s768_s16 }
  0x1e   :  { %p775_p0 = por %p774_p13, %p773_p12 }
  0x20   :  { %p776_p1 = pnand %p775_p0, %p769_p11 }
  0x22   :  { %779 = shalt.err (!%p776_p1)
}
  0x23   :  { %25 = dma.hbm_to_vmem [thread:$0]  %s1001_s0, 256, %s891_s21, [#allocation3], %s856_s30, %s856_s30, %s857_s6  }
  0x24   :  { %s858_s18 = smov [#allocation7]   ;;  %s859_s20 = smov [#allocation8]  }
  0x25   :  { %s43_s19 = sshll.u32 %s858_s18, 4  ;;  %s55_s22 = sshll.u32 %s859_s20, 4  ;;  %s44_s19 = int_to_ptr.vmem [resolvable:$true] %s43_s19  ;;  %s928_s22 = int_to_ptr.vmem [resolvable:$true] %s55_s22 }
  0x26   :  { %s780_s25 = scalar_lea.hbm %s1003_s2, 2048 }
  0x27   :  { %p781_p2 = scmp.ne.s32.totalorder %s1003_s2, %s780_s25  ;;  %p784_p3 = scmp.lt.u32.totalorder %s780_s25, %s1003_s2 }
  0x29   :  { %p786_p4 = pnand %p784_p3, %p781_p2 }
  0x2b   :  { %789 = shalt.err (!%p786_p4)
}
  0x2c   :  { %s790_s0 = scalar_lea.vmem %s44_s19, 2048  ;;  %p795_p6 = scmp.lt.s32.totalorder %s44_s19, %s44_s19 }
  0x2d   :  { %p791_p5 = scmp.ne.s32.totalorder %s44_s19, %s790_s0  ;;  %p796_p7 = scmp.lt.s32.totalorder %s790_s0, %s790_s0 }
  0x2f   :  { %p797_p8 = por %p796_p7, %p795_p6 }
  0x31   :  { %p798_p9 = pnand %p797_p8, %p791_p5 }
  0x33   :  { %801 = shalt.err (!%p798_p9)
}
  0x34   :  { %49 = dma.hbm_to_vmem [thread:$0]  %s1003_s2, 2048, %s44_s19, [#allocation6], %s856_s30, %s856_s30, %s857_s6  }
  0x35   :  { %s802_s10 = scalar_lea.hbm %s1004_s3, 2048 }
  0x36   :  { %p803_p10 = scmp.ne.s32.totalorder %s1004_s3, %s802_s10  ;;  %p806_p11 = scmp.lt.u32.totalorder %s802_s10, %s1004_s3 }
  0x38   :  { %p808_p12 = pnand %p806_p11, %p803_p10 }
  0x3a   :  { %811 = shalt.err (!%p808_p12)
}
  0x3b   :  { %s812_s15 = scalar_lea.vmem %s928_s22, 2048  ;;  %p817_p0 = scmp.lt.s32.totalorder %s928_s22, %s928_s22 }
  0x3c   :  { %p813_p13 = scmp.ne.s32.totalorder %s928_s22, %s812_s15  ;;  %p818_p1 = scmp.lt.s32.totalorder %s812_s15, %s812_s15 }
  0x3e   :  { %p819_p2 = por %p818_p1, %p817_p0 }
  0x40   :  { %p820_p3 = pnand %p819_p2, %p813_p13 }
  0x42   :  { %823 = shalt.err (!%p820_p3)
}
  0x43   :  { %61 = dma.hbm_to_vmem [thread:$0]  %s1004_s3, 2048, %s928_s22, [#allocation9], %s856_s30, %s856_s30, %s857_s6  }
  0x44   :  { %846 = dma.done.wait [#allocation3], 256  }
  0x45   :  { %847 = vsyncadd [#allocation3], 4294967040 }
  0x46   :  { %848 = dma.done.wait [#allocation6], 4096  }
  0x47   :  { %849 = vsyncadd [#allocation6], 4294963200 }
  0x48   :  { %850 = dma.done.wait [#allocation9], 2048  }
  0x49   :  { %851 = vsyncadd [#allocation9], 4294965248  ;;  %v79_v0 = vld [vmem:[#allocation5] sm:$0xff]  ;;  %v80_v1 = vld [vmem:[#allocation5 + $0x8] sm:$0xff]  ;;  %v95_v50 = vlaneseq }
  0x4a   :  { %v81_v2 = vld [vmem:[#allocation5 + $0x10] sm:$0xff]  ;;  %v629_v3 = vpack.c.bf16 %v80_v1, %v79_v0  ;;  %v82_v4 = vld [vmem:[#allocation5 + $0x18] sm:$0xff]  ;;  %v83_v6 = vld [vmem:[#allocation5 + $0x20] sm:$0xff] }
  0x4b   :  { %v633_v5 = vpack.c.bf16 %v82_v4, %v81_v2  ;;  %v84_v7 = vld [vmem:[#allocation5 + $0x28] sm:$0xff]  ;;  %v76_v9 = vld [vmem:[#allocation2] sm:$0xff]  ;;  %v86_v11 = vld [vmem:[#allocation5 + $0x38] sm:$0xff]  ;;  %v965_v51 = vshrl.u32 %v95_v50, 7 }
  0x4c   :  { %630 = vmatprep.subr.bf16.mxu0 %v629_v3  ;;  %v637_v8 = vpack.c.bf16 %v84_v7, %v83_v6  ;;  %v85_v10 = vld [vmem:[#allocation5 + $0x30] sm:$0xff]  ;;  %556 = vmatprep.mubr.f32.mxu0 %v76_v9  ;;  %v87_v13 = vld [vmem:[#allocation5 + $0x40] sm:$0xff]  ;;  %v88_v14 = vld [vmem:[#allocation5 + $0x48] sm:$0xff] }
  0x4d   :  { %632 = vmatpush3.bf16.msra.mxu0 %v629_v3  ;;  %v641_v12 = vpack.c.bf16 %v86_v11, %v85_v10  ;;  %v645_v15 = vpack.c.bf16 %v88_v14, %v87_v13  ;;  %v89_v16 = vld [vmem:[#allocation5 + $0x50] sm:$0xff]  ;;  %v90_v17 = vld [vmem:[#allocation5 + $0x58] sm:$0xff]  ;;  %v91_v19 = vld [vmem:[#allocation5 + $0x60] sm:$0xff]  ;;  %v97_v52 = vsub.s32 0, %v965_v51 }
  0x4e   :  { %634 = vmatprep.subr.bf16.mxu0 %v633_v5  ;;  %v649_v18 = vpack.c.bf16 %v90_v17, %v89_v16  ;;  %v92_v20 = vld [vmem:[#allocation5 + $0x68] sm:$0xff]  ;;  %v93_v22 = vld [vmem:[#allocation5 + $0x70] sm:$0xff]  ;;  %v94_v23 = vld [vmem:[#allocation5 + $0x78] sm:$0xff]  ;;  %v205_v16 = vsub.s32 1, %v965_v51 }
  0x4f   :  { %v653_v21 = vpack.c.bf16 %v92_v20, %v91_v19  ;;  %v657_v24 = vpack.c.bf16 %v94_v23, %v93_v22  ;;  %v77_v25 = vld [vmem:[#allocation2 + $0x8] sm:$0xff]  ;;  %v217_v26 = vld [vmem:[#allocation7] sm:$0xff]  ;;  %v218_v27 = vld [vmem:[#allocation7 + $0x8] sm:$0xff]  ;;  %v211_v23 = vsub.s32 2, %v965_v51 }
  0x50   :  { %v661_v28 = vpack.c.bf16 %v218_v27, %v217_v26  ;;  %v219_v29 = vld [vmem:[#allocation7 + $0x10] sm:$0xff]  ;;  %v220_v30 = vld [vmem:[#allocation7 + $0x18] sm:$0xff]  ;;  %v221_v32 = vld [vmem:[#allocation7 + $0x20] sm:$0xff] }
  0x51   :  { %636 = vmatpush3.bf16.msra.mxu0 %v633_v5  ;;  %v665_v31 = vpack.c.bf16 %v220_v30, %v219_v29  ;;  %v222_v33 = vld [vmem:[#allocation7 + $0x28] sm:$0xff]  ;;  %v223_v35 = vld [vmem:[#allocation7 + $0x30] sm:$0xff]  ;;  %v224_v36 = vld [vmem:[#allocation7 + $0x38] sm:$0xff] }
  0x52   :  { %638 = vmatprep.subr.bf16.mxu0 %v637_v8  ;;  %662 = vmatprep.subr.bf16.mxu1 %v661_v28  ;;  %v669_v34 = vpack.c.bf16 %v222_v33, %v221_v32  ;;  %v673_v37 = vpack.c.bf16 %v224_v36, %v223_v35  ;;  %v225_v38 = vld [vmem:[#allocation7 + $0x40] sm:$0xff]  ;;  %v226_v39 = vld [vmem:[#allocation7 + $0x48] sm:$0xff]  ;;  %v227_v41 = vld [vmem:[#allocation7 + $0x50] sm:$0xff] }
  0x53   :  { %664 = vmatpush3.bf16.msra.mxu1 %v661_v28  ;;  %v677_v40 = vpack.c.bf16 %v226_v39, %v225_v38  ;;  %v228_v42 = vld [vmem:[#allocation7 + $0x58] sm:$0xff]  ;;  %v229_v44 = vld [vmem:[#allocation7 + $0x60] sm:$0xff]  ;;  %v230_v45 = vld [vmem:[#allocation7 + $0x68] sm:$0xff] }
  0x54   :  { %666 = vmatprep.subr.bf16.mxu1 %v665_v31  ;;  %v681_v43 = vpack.c.bf16 %v228_v42, %v227_v41  ;;  %v685_v46 = vpack.c.bf16 %v230_v45, %v229_v44  ;;  %v231_v47 = vld [vmem:[#allocation7 + $0x70] sm:$0xff]  ;;  %v232_v48 = vld [vmem:[#allocation7 + $0x78] sm:$0xff]  ;;  %v355_v32 = vld [vmem:[#allocation8 + $0x8] sm:$0xff] }
  0x55   :  { %640 = vmatpush3.bf16.msra.mxu0 %v637_v8  ;;  %v689_v49 = vpack.c.bf16 %v232_v48, %v231_v47  ;;  %v971_v53 = vld [vmem:[%s1005_s4] sm:$0xff]  ;;  %v357_v35 = vld [vmem:[#allocation8 + $0x18] sm:$0xff]  ;;  %v359_v38 = vld [vmem:[#allocation8 + $0x28] sm:$0xff]  ;;  %s860_s4 = smov [#allocation10]  }
  0x56   :  { %642 = vmatprep.subr.bf16.mxu0 %v641_v12  ;;  %v98_v54 = vrot.slane %v971_v53, %v97_v52  ;;  %v361_v41 = vld [vmem:[#allocation8 + $0x38] sm:$0xff]  ;;  %v363_v44 = vld [vmem:[#allocation8 + $0x48] sm:$0xff]  ;;  %v368_v52 = vld [vmem:[#allocation8 + $0x70] sm:$0xff]  ;;  %s456_s17 = sshll.u32 %s860_s4, 4  ;;  %s457_s17 = int_to_ptr.vmem [resolvable:$true] %s456_s17 }
  0x57   :  { %668 = vmatpush3.bf16.msra.mxu1 %v665_v31  ;;  %v354_v31 = vld [vmem:[#allocation8] sm:$0xff]  ;;  %v365_v47 = vld [vmem:[#allocation8 + $0x58] sm:$0xff]  ;;  %v367_v50 = vld [vmem:[#allocation8 + $0x68] sm:$0xff]  ;;  %s824_s18 = scalar_lea.vmem %s457_s17, 256  ;;  %p829_p5 = scmp.lt.s32.totalorder %s457_s17, %s457_s17 }
  0x58   :  { %670 = vmatprep.subr.bf16.mxu1 %v669_v34  ;;  %v693_v33 = vpack.c.bf16 %v355_v32, %v354_v31  ;;  %p825_p4 = scmp.ne.s32.totalorder %s457_s17, %s824_s18  ;;  %p830_p6 = scmp.lt.s32.totalorder %s824_s18, %s824_s18 }
  0x59   :  { %644 = vmatpush3.bf16.msra.mxu0 %v641_v12 }
  0x5a   :  { %646 = vmatprep.subr.bf16.mxu0 %v645_v15  ;;  %p831_p7 = por %p830_p6, %p829_p5 }
  0x5b   :  { %672 = vmatpush3.bf16.msra.mxu1 %v669_v34  ;;  %v356_v34 = vld [vmem:[#allocation8 + $0x10] sm:$0xff] }
  0x5c   :  { %674 = vmatprep.subr.bf16.mxu1 %v673_v37  ;;  %v697_v36 = vpack.c.bf16 %v357_v35, %v356_v34  ;;  %v372_v35 = vsub.s32 6, %v965_v51  ;;  %p832_p8 = pnand %p831_p7, %p825_p4 }
  0x5d   :  { %648 = vmatpush3.bf16.msra.mxu0 %v645_v15 }
  0x5e   :  { %650 = vmatprep.subr.bf16.mxu0 %v649_v18 }
  0x5f   :  { %676 = vmatpush3.bf16.msra.mxu1 %v673_v37  ;;  %v358_v37 = vld [vmem:[#allocation8 + $0x20] sm:$0xff] }
  0x60   :  { %678 = vmatprep.subr.bf16.mxu1 %v677_v40  ;;  %v701_v39 = vpack.c.bf16 %v359_v38, %v358_v37 }
  0x61   :  { %652 = vmatpush3.bf16.msra.mxu0 %v649_v18 }
  0x62   :  { %654 = vmatprep.subr.bf16.mxu0 %v653_v21 }
  0x63   :  { %680 = vmatpush3.bf16.msra.mxu1 %v677_v40  ;;  %v360_v40 = vld [vmem:[#allocation8 + $0x30] sm:$0xff] }
  0x64   :  { %682 = vmatprep.subr.bf16.mxu1 %v681_v43  ;;  %v705_v42 = vpack.c.bf16 %v361_v41, %v360_v40 }
  0x65   :  { %656 = vmatpush3.bf16.msra.mxu0 %v653_v21 }
  0x66   :  { %658 = vmatprep.subr.bf16.mxu0 %v657_v24 }
  0x67   :  { %684 = vmatpush3.bf16.msra.mxu1 %v681_v43  ;;  %v362_v43 = vld [vmem:[#allocation8 + $0x40] sm:$0xff] }
  0x68   :  { %686 = vmatprep.subr.bf16.mxu1 %v685_v46  ;;  %v709_v45 = vpack.c.bf16 %v363_v44, %v362_v43 }
  0x69   :  { %660 = vmatpush3.bf16.msra.mxu0 %v657_v24 }
  0x6a   :  { %694 = vmatprep.subr.bf16.mxu0 %v693_v33 }
  0x6b   :  { %688 = vmatpush3.bf16.msra.mxu1 %v685_v46  ;;  %v364_v46 = vld [vmem:[#allocation8 + $0x50] sm:$0xff] }
  0x6c   :  { %557 = vmatmul.mubr.f32.vlgmr.msra.gmra.mrb[0].mxu0 %v77_v25  ;;  %690 = vmatprep.subr.bf16.mxu1 %v689_v49  ;;  %v713_v48 = vpack.c.bf16 %v365_v47, %v364_v46 }
  0x6d   :  { %696 = vmatpush3.bf16.msra.mxu0 %v693_v33 }
  0x6e   :  { %698 = vmatprep.subr.bf16.mxu0 %v697_v36 }
  0x6f   :  { %692 = vmatpush3.bf16.msra.mxu1 %v689_v49  ;;  %v366_v49 = vld [vmem:[#allocation8 + $0x60] sm:$0xff] }
  0x71   :  { %700 = vmatpush3.bf16.msra.mxu0 %v697_v36  ;;  %v373_v36 = vrot.slane %v971_v53, %v372_v35 }
  0x72   :  { %702 = vmatprep.subr.bf16.mxu0 %v701_v39 }
  0x75   :  { %704 = vmatpush3.bf16.msra.mxu0 %v701_v39 }
  0x76   :  { %706 = vmatprep.subr.bf16.mxu0 %v705_v42 }
  0x79   :  { %708 = vmatpush3.bf16.msra.mxu0 %v705_v42 }
  0x7a   :  { %710 = vmatprep.subr.bf16.mxu0 %v709_v45 }
  0x7d   :  { %712 = vmatpush3.bf16.msra.mxu0 %v709_v45 }
  0x7e   :  { %714 = vmatprep.subr.bf16.mxu0 %v713_v48 }
  0x81   :  { %716 = vmatpush3.bf16.msra.mxu0 %v713_v48 }
 0x13f   :  { %v558_v55 = vpop.f32.mrb[0].mxu0 }
 0x140   :  { %v171_v56 = vadd.f32 %v558_v55, %v98_v54  ;;  %v165_v57 = vpop.f32.mrb[1].mxu0  ;;  %v369_v55 = vld [vmem:[#allocation8 + $0x78] sm:$0xff] }
 0x141   :  { %v166_v58 = vadd.f32 %v165_v57, %v98_v54  ;;  %v717_v54 = vpack.c.bf16 %v367_v50, %v366_v49  ;;  %v235_v57 = vsub.s32 3, %v965_v51 }
 0x143   :  { %v174_v59 = vadd.f32 %v171_v56, %v166_v58  ;;  %718 = vmatprep.subr.bf16.mxu0 %v717_v54 }
 0x144   :  { %720 = vmatpush3.bf16.msra.mxu0 %v717_v54 }
 0x145   :  { %v175_v60 = vrot.slane %v174_v59, 4 }
 0x147   :  { %v176_v61 = vadd.f32 %v175_v60, %v174_v59 }
 0x149   :  { %v177_v62 = vrot.slane %v176_v61, 2 }
 0x14b   :  { %v178_v63 = vadd.f32 %v177_v62, %v176_v61 }
 0x14d   :  { %v179_v0 = vrot.slane %v178_v63, 1 }
 0x14f   :  { %v180_v1 = vadd.f32 %v179_v0, %v178_v63 }
 0x151   :  { %v182_v2 = vmul.f32 0.0625, %v180_v1 }
 0x153   :  { %v183_v3 = vsub.f32 %v166_v58, %v182_v2  ;;  %v184_v4 = vsub.f32 %v171_v56, %v182_v2 }
 0x155   :  { %v185_v5 = vmul.f32 %v183_v3, %v183_v3  ;;  %v186_v6 = vmul.f32 %v184_v4, %v184_v4 }
 0x157   :  { %v187_v7 = vadd.f32 %v186_v6, %v185_v5 }
 0x159   :  { %v188_v8 = vrot.slane %v187_v7, 4 }
 0x15b   :  { %v189_v9 = vadd.f32 %v188_v8, %v187_v7 }
 0x15d   :  { %v190_v10 = vrot.slane %v189_v9, 2 }
 0x15f   :  { %v191_v11 = vadd.f32 %v190_v10, %v189_v9 }
 0x161   :  { %v192_v12 = vrot.slane %v191_v11, 1 }
 0x163   :  { %v193_v13 = vadd.f32 %v192_v12, %v191_v11 }
 0x165   :  { %v194_v14 = vmul.f32 0.0625, %v193_v13 }
 0x167   :  { %v195_v15 = vadd.f32 1e-05, %v194_v14 }
 0x169   :  { %732 = vrsqrt.f32 %v195_v15 }
 0x173   :  { %v733_v17 = vpop.eup %732 }
 0x174   :  { %v197_v18 = vmul.f32 %v733_v17, %v971_v53 }
 0x176   :  { %v198_v19 = vmul.f32 %v197_v18, %v182_v2  ;;  %v206_v20 = vrot.slane %v197_v18, %v205_v16 }
 0x178   :  { %v200_v21 = vrot.slane %v198_v19, 7  ;;  %v207_v22 = vmul.f32 %v206_v20, %v166_v58  ;;  %v208_v24 = vmul.f32 %v206_v20, %v171_v56  ;;  %v721_v56 = vpack.c.bf16 %v369_v55, %v368_v52 }
 0x179   :  { %v236_v58 = vrot.slane %v971_v53, %v235_v57  ;;  %v342_v20 = vsub.s32 4, %v965_v51 }
 0x17a   :  { %v202_v25 = vsub.f32 %v971_v53, %v200_v21  ;;  %722 = vmatprep.subr.bf16.mxu0 %v721_v56 }
 0x17b   :  { %724 = vmatpush3.bf16.msra.mxu0 %v721_v56 }
 0x17c   :  { %v212_v26 = vrot.slane %v202_v25, %v211_v23 }
 0x17e   :  { %v213_v27 = vadd.f32 %v212_v26, %v207_v22  ;;  %v214_v28 = vadd.f32 %v212_v26, %v208_v24 }
 0x180   :  { %v215_v29 = vmax.f32 %v213_v27, 0.0  ;;  %v216_v30 = vmax.f32 %v214_v28, 0.0  ;;  %v348_v28 = vsub.s32 5, %v965_v51 }
 0x182   :  { %591 = vmatprep.mubr.f32.mxu1 %v215_v29 }
 0x183   :  { %592 = vmatmul.mubr.f32.vlgmr.msra.gmra.mrb[0].mxu1 %v216_v30 }
 0x256   :  { %v593_v59 = vpop.f32.mrb[0].mxu1 }
 0x257   :  { %v309_v60 = vadd.f32 %v593_v59, %v236_v58  ;;  %v303_v61 = vpop.f32.mrb[1].mxu1 }
 0x258   :  { %v304_v62 = vadd.f32 %v303_v61, %v236_v58 }
 0x25a   :  { %v312_v63 = vadd.f32 %v309_v60, %v304_v62 }
 0x25c   :  { %v313_v0 = vrot.slane %v312_v63, 4 }
 0x25e   :  { %v314_v1 = vadd.f32 %v313_v0, %v312_v63 }
 0x260   :  { %v315_v2 = vrot.slane %v314_v1, 2 }
 0x262   :  { %v316_v3 = vadd.f32 %v315_v2, %v314_v1 }
 0x264   :  { %v317_v4 = vrot.slane %v316_v3, 1 }
 0x266   :  { %v318_v5 = vadd.f32 %v317_v4, %v316_v3 }
 0x268   :  { %v319_v6 = vmul.f32 0.0625, %v318_v5 }
 0x26a   :  { %v320_v7 = vsub.f32 %v304_v62, %v319_v6  ;;  %v321_v8 = vsub.f32 %v309_v60, %v319_v6 }
 0x26c   :  { %v322_v9 = vmul.f32 %v320_v7, %v320_v7  ;;  %v323_v10 = vmul.f32 %v321_v8, %v321_v8 }
 0x26e   :  { %v324_v11 = vadd.f32 %v323_v10, %v322_v9 }
 0x270   :  { %v325_v12 = vrot.slane %v324_v11, 4 }
 0x272   :  { %v326_v13 = vadd.f32 %v325_v12, %v324_v11 }
 0x274   :  { %v327_v14 = vrot.slane %v326_v13, 2 }
 0x276   :  { %v328_v15 = vadd.f32 %v327_v14, %v326_v13 }
 0x278   :  { %v329_v16 = vrot.slane %v328_v15, 1 }
 0x27a   :  { %v330_v17 = vadd.f32 %v329_v16, %v328_v15 }
 0x27c   :  { %v331_v18 = vmul.f32 0.0625, %v330_v17 }
 0x27e   :  { %v332_v19 = vadd.f32 1e-05, %v331_v18 }
 0x280   :  { %734 = vrsqrt.f32 %v332_v19 }
 0x28a   :  { %v735_v21 = vpop.eup %734 }
 0x28b   :  { %v334_v22 = vmul.f32 %v735_v21, %v971_v53 }
 0x28d   :  { %v343_v23 = vrot.slane %v334_v22, %v342_v20  ;;  %v335_v24 = vmul.f32 %v334_v22, %v319_v6 }
 0x28f   :  { %v344_v25 = vmul.f32 %v343_v23, %v304_v62  ;;  %v345_v26 = vmul.f32 %v343_v23, %v309_v60  ;;  %v337_v27 = vrot.slane %v335_v24, 7 }
 0x291   :  { %v339_v29 = vsub.f32 %v971_v53, %v337_v27 }
 0x293   :  { %v349_v30 = vrot.slane %v339_v29, %v348_v28 }
 0x295   :  { %v350_v31 = vadd.f32 %v349_v30, %v344_v25  ;;  %v351_v32 = vadd.f32 %v349_v30, %v345_v26 }
 0x297   :  { %v352_v33 = vmax.f32 %v350_v31, 0.0  ;;  %v353_v34 = vmax.f32 %v351_v32, 0.0 }
 0x299   :  { %626 = vmatprep.mubr.f32.mxu0 %v352_v33 }
 0x29a   :  { %627 = vmatmul.mubr.f32.vlgmr.msra.gmra.mrb[2].mxu0 %v353_v34 }
 0x36d   :  { %v628_v37 = vpop.f32.mrb[2].mxu0 }
 0x36e   :  { %v446_v38 = vadd.f32 %v628_v37, %v373_v36  ;;  %v440_v39 = vpop.f32.mrb[3].mxu0 }
 0x36f   :  { %v441_v40 = vadd.f32 %v440_v39, %v373_v36 }
 0x370   :  { %450 = vst [vmem:[#allocation10 + $0x8] sm:$0xff] %v446_v38 }
 0x371   :  { %449 = vst [vmem:[#allocation10] sm:$0xff] %v441_v40 }
 0x372   :  { %835 = shalt.err (!%p832_p8)
}
 0x373   :  { %s836_s22 = scalar_lea.hbm %s1006_s5, 256 }
 0x374   :  { %p837_p9 = scmp.ne.s32.totalorder %s1006_s5, %s836_s22  ;;  %p840_p10 = scmp.lt.u32.totalorder %s836_s22, %s1006_s5 }
 0x376   :  { %p842_p11 = pnand %p840_p10, %p837_p9 }
 0x378   :  { %845 = shalt.err (!%p842_p11)
}
 0x379   :  { %462 = dma.vmem_to_hbm [thread:$0]  %s457_s17, 256, %s1006_s5, [#allocation4], %s856_s30, %s856_s30, %s857_s6  }
 0x37a   :  { %852 = dma.done.wait [#allocation4], 256  }
 0x37b   :  { %853 = vsyncadd [#allocation4], 4294967040 }
 0x37c   :  { %466 = vsyncpa [#allocation3], 1 }
 0x37d   :  { %467 = vsyncpa [#allocation6], 1 }
 0x37e   :  { %468 = vsyncpa [#allocation9], 1 }
 0x37f   :  { %469 = vsyncpa [#allocation4], 1 }

</bundles_post_ra>
